<compile_context>
chip_gen: v5e
topology: v5e:2x2
jax: 0.10.0
libtpu: 0.0.40
codegen_flags: <defaults>
</compile_context>

<pallas_src>
import jax
import jax.numpy as jnp
from jax import lax
from jax.experimental import pallas as pl
from jax.experimental.pallas import tpu as pltpu

EPS = 1e-5  # PyTorch F.layer_norm default


def _layernorm_kernel(x_ref, w_ref, o_ref):
    # x_ref: (TM, D) tile of rows, w_ref: (1, D) scale, o_ref: (TM, D) output
    x = x_ref[...].astype(jnp.float32)
    mean = jnp.mean(x, axis=-1, keepdims=True)
    centered = x - mean
    var = jnp.mean(centered * centered, axis=-1, keepdims=True)
    inv = lax.rsqrt(var + EPS)
    o_ref[...] = (centered * inv * w_ref[...]).astype(o_ref.dtype)


def _pick_row_tile(rows, d, in_itemsize, out_itemsize,
                   target_rows=512, vmem_budget_bytes=24 * 1024 * 1024):
    """Biggest row tile <= target that keeps double-buffered in+out tiles in budget."""
    per_row = d * 2 * (in_itemsize + out_itemsize)  # x2 for double buffering
    tm = max(1, min(target_rows, vmem_budget_bytes // per_row))
    if rows <= tm:
        return rows                     # single full-extent block (always legal)
    return max(8, (tm // 8) * 8)        # sublane-aligned


def layer_norm(x, weight, *, out_dtype=jnp.float32, row_tile=None):
    """x: (B, S, D) float dtype; weight: (D,). Module semantics: f32 output.

    `out_dtype` can be set to x.dtype (e.g. bf16) to halve HBM writeback traffic
    on this memory-bound kernel when callers accept a lower-precision output.
    """
    B, S, D = x.shape
    rows = B * S
    x2 = x.reshape(rows, D)
    w2 = weight.reshape(1, D).astype(jnp.float32)

    if row_tile is None:
        tm = _pick_row_tile(rows, D, x2.dtype.itemsize, jnp.dtype(out_dtype).itemsize)
    else:
        tm = min(row_tile, rows)

    grid = (pl.cdiv(rows, tm),)  # last block is masked by Pallas if rows % tm != 0

    out = pl.pallas_call(
        _layernorm_kernel,
        out_shape=jax.ShapeDtypeStruct((rows, D), out_dtype),
        grid_spec=pltpu.PrefetchScalarGridSpec(
            num_scalar_prefetch=0,
            grid=grid,
            in_specs=[
                pl.BlockSpec((tm, D), lambda i: (i, 0)),
                pl.BlockSpec((1, D), lambda i: (0, 0)),
            ],
            out_specs=pl.BlockSpec((tm, D), lambda i: (i, 0)),
        ),
        compiler_params=pltpu.CompilerParams(
            dimension_semantics=("parallel",),
            vmem_limit_bytes=32 * 1024 * 1024,
        ),
    )(x2, w2)
    return out.reshape(B, S, D)


if __name__ == "__main__":
    key = jax.random.PRNGKey(0)
    B, S, D = 2, 8, 32
    kx, kw = jax.random.split(key)
    x = jax.random.normal(kx, (B, S, D), dtype=jnp.bfloat16)
    # Module init is torch.ones([dim]); perturb deterministically so the scale matters.
    weight = jnp.ones((D,), dtype=jnp.float32) + 0.01 * jax.random.normal(
        kw, (D,), dtype=jnp.float32)

    # Module-faithful path: f32 output.
    out = layer_norm(x, weight)
    out = jax.block_until_ready(out)

    xf = x.astype(jnp.float32)
    mean = jnp.mean(xf, axis=-1, keepdims=True)
    var = jnp.mean((xf - mean) ** 2, axis=-1, keepdims=True)
    ref = (xf - mean) * lax.rsqrt(var + EPS) * weight[None, None, :]
    assert out.shape == (B, S, D) and out.dtype == jnp.float32
    assert jnp.allclose(out, ref, atol=1e-5, rtol=1e-5)

    # Also exercise the non-divisible-rows tail path and bf16 writeback option.
    x2 = jax.random.normal(kx, (3, 7, 128), dtype=jnp.bfloat16)  # rows = 21
    w2 = jnp.ones((128,), dtype=jnp.float32)
    out2 = jax.block_until_ready(
        layer_norm(x2, w2, out_dtype=jnp.bfloat16, row_tile=8))
    xf2 = x2.astype(jnp.float32)
    m2 = jnp.mean(xf2, axis=-1, keepdims=True)
    v2 = jnp.mean((xf2 - m2) ** 2, axis=-1, keepdims=True)
    ref2 = (xf2 - m2) * lax.rsqrt(v2 + EPS) * w2
    assert out2.shape == (3, 7, 128) and out2.dtype == jnp.bfloat16
    assert jnp.allclose(out2.astype(jnp.float32), ref2, atol=3e-2, rtol=3e-2)

    print("KERNEL_OK")
</pallas_src>

<mosaic_0001>
module attributes {stable_mosaic.version = 11 : i64} {
  func.func @_layernorm_kernel(%arg0: i32, %arg1: memref<16x32xbf16, #tpu.memory_space<vmem>>, %arg2: memref<1x32xf32, #tpu.memory_space<vmem>>, %arg3: memref<16x32xf32, #tpu.memory_space<vmem>>) attributes {dimension_semantics = [#tpu.dimension_semantics<parallel>], iteration_bounds = array<i64: 1>, scalar_prefetch = 0 : i64, scratch_operands = 0 : i64, tpu.core_type = #tpu.core_type<tc>, window_params = [{transform_indices = @transform_0, window_bounds = array<i64: 16, 32>}, {pipeline_mode = #tpu.pipeline_mode<synchronous>, transform_indices = @transform_1, window_bounds = array<i64: 1, 32>}, {transform_indices = @transform_2, window_bounds = array<i64: 16, 32>}]} {
    %c0 = arith.constant 0 : index
    %c0_0 = arith.constant 0 : index
    %0 = vector.load %arg1[%c0, %c0_0] : memref<16x32xbf16, #tpu.memory_space<vmem>>, vector<16x32xbf16>
    %1 = arith.extf %0 : vector<16x32xbf16> to vector<16x32xf32>
    %cst = arith.constant dense<0.000000e+00> : vector<16xf32>
    %2 = vector.multi_reduction <add>, %1, %cst [1] : vector<16x32xf32> to vector<16xf32>
    %3 = vector.shape_cast %2 : vector<16xf32> to vector<16x1xf32>
    %cst_1 = arith.constant 3.200000e+01 : f32
    %4 = vector.broadcast %cst_1 : f32 to vector<16x1xf32>
    %5 = arith.divf %3, %4 : vector<16x1xf32>
    %6 = vector.broadcast %5 : vector<16x1xf32> to vector<16x32xf32>
    %7 = arith.subf %1, %6 : vector<16x32xf32>
    %8 = arith.mulf %7, %7 : vector<16x32xf32>
    %cst_2 = arith.constant dense<0.000000e+00> : vector<16xf32>
    %9 = vector.multi_reduction <add>, %8, %cst_2 [1] : vector<16x32xf32> to vector<16xf32>
    %10 = vector.shape_cast %9 : vector<16xf32> to vector<16x1xf32>
    %cst_3 = arith.constant 3.200000e+01 : f32
    %11 = vector.broadcast %cst_3 : f32 to vector<16x1xf32>
    %12 = arith.divf %10, %11 : vector<16x1xf32>
    %cst_4 = arith.constant 9.99999974E-6 : f32
    %13 = vector.broadcast %cst_4 : f32 to vector<16x1xf32>
    %14 = arith.addf %12, %13 : vector<16x1xf32>
    %15 = math.rsqrt %14 : vector<16x1xf32>
    %16 = vector.broadcast %15 : vector<16x1xf32> to vector<16x32xf32>
    %17 = arith.mulf %7, %16 : vector<16x32xf32>
    %c0_5 = arith.constant 0 : index
    %c0_6 = arith.constant 0 : index
    %18 = vector.load %arg2[%c0_5, %c0_6] : memref<1x32xf32, #tpu.memory_space<vmem>>, vector<1x32xf32>
    %19 = vector.broadcast %18 : vector<1x32xf32> to vector<16x32xf32>
    %20 = arith.mulf %17, %19 : vector<16x32xf32>
    %c0_7 = arith.constant 0 : index
    %c0_8 = arith.constant 0 : index
    %21 = vector.load %arg3[%c0_7, %c0_8] : memref<16x32xf32, #tpu.memory_space<vmem>>, vector<16x32xf32>
    tpu.vector_store %arg3[%c0_7, %c0_8], %20 {strides = array<i32>} : memref<16x32xf32, #tpu.memory_space<vmem>>, vector<16x32xf32>,
    return
  }
  func.func @transform_0(%arg0: i32) -> (i32, i32) {
    %c0_i32 = arith.constant 0 : i32
    %c0_i32_0 = arith.constant 0 : i32
    return %arg0, %c0_i32 : i32, i32
  }
  func.func @transform_1(%arg0: i32) -> (i32, i32) {
    %c0_i32 = arith.constant 0 : i32
    %c0_i32_0 = arith.constant 0 : i32
    %c0_i32_1 = arith.constant 0 : i32
    return %c0_i32, %c0_i32_0 : i32, i32
  }
  func.func @transform_2(%arg0: i32) -> (i32, i32) {
    %c0_i32 = arith.constant 0 : i32
    %c0_i32_0 = arith.constant 0 : i32
    return %arg0, %c0_i32 : i32, i32
  }
}

</mosaic_0001>

<bundles_post_ra>
// kernel: tpu_custom_call.1
= control target key start
LH: loop header
LB: loop body
LE: loop exit
PB: predicated region body
PF: predicated region fallthrough
CT: control target
= control target key end

     0   :  { %7 = vsyncpa [#allocation3], 0  ;;  %s261_s0 = inlined_call_operand.hbm [shape: bf16[16,32], index: 0, kind: input, shape index: {}]   ;;  %s262_s1 = inlined_call_operand.hbm [shape: f32[1,32], index: 1, kind: input, shape index: {}]   ;;  %s263_s2 = inlined_call_operand.hbm [shape: f32[16,32], index: 2, kind: output, shape index: {}]  }
   0x1   :  { %8 = vsyncpa [#allocation6], 0 }
   0x2   :  { %9 = vsyncpa [#allocation4], 0  ;;  %s14_s11 = sshll.u32 %s261_s0, 4  ;;  %s223_s12 = smov [#allocation2]   ;;  %s15_s11 = int_to_ptr.hbm [resolvable:$true] %s14_s11 }
   0x3   :  { %s16_s13 = sshll.u32 %s223_s12, 4  ;;  %s28_s16 = sshll.u32 %s262_s1, 4  ;;  %s17_s13 = int_to_ptr.vmem [resolvable:$true] %s16_s13  ;;  %s29_s16 = int_to_ptr.hbm [resolvable:$true] %s28_s16 }
   0x4   :  { %s224_s17 = smov 64   ;;  %s225_s18 = smov 4  }
   0x5   :  { %22 = dma.hbm_to_vmem [thread:$0]  %s15_s11, 128, %s17_s13, [#allocation3], %s224_s17, %s224_s17, %s225_s18  }
   0x6   :  { %s226_s19 = smov [#allocation5]  }
   0x7   :  { %s30_s20 = sshll.u32 %s226_s19, 4  ;;  %s31_s20 = int_to_ptr.vmem [resolvable:$true] %s30_s20 }
   0x8   :  { %33 = dma.hbm_to_vmem [thread:$0]  %s29_s16, 16, %s31_s20, [#allocation6]  }
   0x9   :  { %217 = dma.done.wait [#allocation3], 128  }
   0xa   :  { %218 = vsyncadd [#allocation3], 4294967168 }
   0xb   :  { %219 = dma.done.wait [#allocation6], 16  }
   0xc   :  { %220 = vsyncadd [#allocation6], 4294967280  ;;  %v127_v0 = vld [vmem:[#allocation2] sm:$0xff]   ;;  %vm46_vm0 = vcmask 261120   ;;  %v227_v5 = vmov 32.0   ;;  %s228_s0 = smov [#allocation7]  }
   0xd   :  { %v128_v1 = vunpack.c.l.bf16 %v127_v0  ;;  %v129_v3 = vunpack.c.h.bf16 %v127_v0  ;;  %139 = vrcp.f32 %v227_v5  ;;  %v138_v36 = vld [vmem:[#allocation5] ss:$0 sm:$0xff]  ;;  %s110_s1 = sshll.u32 %s228_s0, 4  ;;  %s112_s23 = sshll.u32 %s263_s2, 4  ;;  %s111_s1 = int_to_ptr.vmem [resolvable:$true] %s110_s1  ;;  %s113_s23 = int_to_ptr.hbm [resolvable:$true] %s112_s23 }
   0xe   :  { %s229_s24 = smov 128   ;;  %s230_s25 = smov 8  }
   0xf   :  { %v47_v2 = vsel %vm46_vm0, %v128_v1, 0.0  ;;  %v50_v4 = vsel %vm46_vm0, %v129_v3, 0.0 }
  0x10   :  { %48 = vadd.xlane.f32.xlu0 %v47_v2 }
  0x13   :  { %v140_v6 = vpop.eup %139 }
  0x14   :  { %v54_v7 = vmul.f32 32.0, %v140_v6  ;;  %vm58_vm1 = vweird.f32 %v140_v6 }
  0x16   :  { %v55_v8 = vsub.f32 1.0, %v54_v7 }
  0x18   :  { %51 = vadd.xlane.f32.xlu0 %v50_v4  ;;  %v56_v9 = vmul.f32 %v140_v6, %v55_v8 }
  0x1a   :  { %v57_v10 = vadd.f32 %v140_v6, %v56_v9 }
  0x1c   :  { %v59_v11 = vsel %vm58_vm1, %v140_v6, %v57_v10 }
  0x83   :  { %v49_v12 = vpop.xlane.xlu0 %48 }
  0x84   :  { %v60_v13 = vmul.f32 %v59_v11, %v49_v12 }
  0x86   :  { %v62_v14 = vsub.f32 %v128_v1, %v60_v13 }
  0x88   :  { %v64_v15 = vmul.f32 %v62_v14, %v62_v14 }
  0x8a   :  { %v66_v16 = vsel %vm46_vm0, %v64_v15, 0.0 }
  0x8b   :  { %67 = vadd.xlane.f32.xlu1 %v66_v16  ;;  %v52_v17 = vpop.xlane.xlu0 %51 }
  0x8c   :  { %v61_v18 = vmul.f32 %v59_v11, %v52_v17 }
  0x8e   :  { %v63_v19 = vsub.f32 %v129_v3, %v61_v18 }
  0x90   :  { %v65_v20 = vmul.f32 %v63_v19, %v63_v19 }
  0x92   :  { %v69_v21 = vsel %vm46_vm0, %v65_v20, 0.0 }
  0x93   :  { %70 = vadd.xlane.f32.xlu1 %v69_v21 }
  0xfe   :  { %v68_v22 = vpop.xlane.xlu1 %67 }
  0xff   :  { %v72_v23 = vmul.f32 %v68_v22, %v59_v11 }
 0x101   :  { %v74_v24 = vadd.f32 1e-05, %v72_v23 }
 0x103   :  { %141 = vrsqrt.f32 %v74_v24  ;;  %vm82_vm3 = vweird.f32 %v74_v24 }
 0x106   :  { %v71_v25 = vpop.xlane.xlu1 %70 }
 0x107   :  { %v73_v26 = vmul.f32 %v71_v25, %v59_v11 }
 0x109   :  { %v142_v27 = vpop.eup %141  ;;  %v75_v28 = vadd.f32 1e-05, %v73_v26 }
 0x10a   :  { %v77_v29 = vmul.f32 %v142_v27, %v74_v24  ;;  %vm83_vm2 = vweird.f32 %v142_v27 }
 0x10b   :  { %143 = vrsqrt.f32 %v75_v28  ;;  %vm84_vm4 = vmor %vm82_vm3, %vm83_vm2  ;;  %vm92_vm6 = vweird.f32 %v75_v28 }
 0x10c   :  { %v78_v30 = vmul.f32 %v142_v27, %v77_v29 }
 0x10e   :  { %v79_v31 = vmul.f32 0.5, %v78_v30 }
 0x110   :  { %v80_v32 = vsub.f32 1.5, %v79_v31 }
 0x111   :  { %v144_v33 = vpop.eup %143 }
 0x112   :  { %v81_v34 = vmul.f32 %v142_v27, %v80_v32  ;;  %v87_v35 = vmul.f32 %v144_v33, %v75_v28  ;;  %vm93_vm5 = vweird.f32 %v144_v33 }
 0x113   :  { %vm94_vm7 = vmor %vm92_vm6, %vm93_vm5 }
 0x114   :  { %v85_v37 = vsel %vm84_vm4, %v142_v27, %v81_v34  ;;  %v88_v38 = vmul.f32 %v144_v33, %v87_v35 }
 0x115   :  { %v96_v39 = vmul.f32 %v85_v37, %v62_v14 }
 0x116   :  { %v89_v40 = vmul.f32 0.5, %v88_v38 }
 0x117   :  { %v102_v41 = vmul.f32 %v138_v36, %v96_v39 }
 0x118   :  { %v90_v42 = vsub.f32 1.5, %v89_v40 }
 0x119   :  { %104 = vst.msk [vmem:[#allocation7] sm:$0xff] %vm46_vm0, %v102_v41 }
 0x11a   :  { %v91_v43 = vmul.f32 %v144_v33, %v90_v42 }
 0x11c   :  { %v95_v44 = vsel %vm94_vm7, %v144_v33, %v91_v43 }
 0x11d   :  { %v97_v45 = vmul.f32 %v95_v44, %v63_v19 }
 0x11f   :  { %v103_v46 = vmul.f32 %v138_v36, %v97_v45 }
 0x121   :  { %105 = vst.msk [vmem:[#allocation7 + $0x8] sm:$0xff] %vm46_vm0, %v103_v46 }
 0x122   :  { %118 = dma.vmem_to_hbm [thread:$0]  %s111_s1, 256, %s113_s23, [#allocation4], %s229_s24, %s229_s24, %s230_s25  }
 0x123   :  { %221 = dma.done.wait [#allocation4], 256  }
 0x124   :  { %222 = vsyncadd [#allocation4], 4294967040 }
 0x125   :  { %123 = vsyncpa [#allocation3], 1 }
 0x126   :  { %124 = vsyncpa [#allocation6], 1 }
 0x127   :  { %125 = vsyncpa [#allocation4], 1 }

</bundles_post_ra>
